<compile_context>
chip_gen: v5e
topology: v5e:2x2
jax: 0.10.0
libtpu: 0.0.40
codegen_flags: <defaults>
</compile_context>

<pallas_src>
import jax
import jax.numpy as jnp
from jax import lax
from jax.experimental import pallas as pl
from jax.experimental.pallas import tpu as pltpu

LANE = 128                # lane width (last dim of every tile)
SUBLANES = 8              # f32 sublanes per vreg
SLAB_ROWS = 32            # rows per in-register streaming slab (4 vregs / array)
TARGET_BLOCK_ROWS = 4096  # rows per DMA block (2 MiB f32 per input per step)
INNER_UNROLL = 4          # partial unroll of the slab loop


def _make_kernel(rows, block_rows, slab_rows, tiles_per_shard, has_partial,
                 assume_binary_mask):
    """Build the kernel body; all tiling parameters are compile-time Python ints."""
    num_slabs = block_rows // slab_rows

    def slab_terms(x, m, valid):
        # x, m: (slab_rows, LANE) f32; valid: bool mask or None.
        p = jax.nn.sigmoid(x)
        pm = p * m
        if assume_binary_mask:
            # One log instead of two; exact only for hard 0/1 masks.
            bce = -jnp.maximum(jnp.log(m * x + (1.0 - m) * (1.0 - x)), -100.0)
        else:
            # nn.BCELoss semantics (each log clamped at -100); soft-target safe.
            log_x = jnp.maximum(jnp.log(x), -100.0)
            log_1mx = jnp.maximum(jnp.log1p(-x), -100.0)
            bce = -(log_1mx + m * (log_x - log_1mx))
        if valid is not None:
            # Boundary-block rows past `rows` hold undefined data; use selects
            # (not multiplies) so stray NaN/Inf never reach the sums.
            pm = jnp.where(valid, pm, 0.0)
            p = jnp.where(valid, p, 0.0)
            m = jnp.where(valid, m, 0.0)
            bce = jnp.where(valid, bce, 0.0)
        return pm, p, m, bce

    def kernel(x_ref, m_ref, o_ref, acc_ref):
        c = pl.program_id(0)
        i = pl.program_id(1)

        @pl.when(i == 0)
        def _init():
            acc_ref[...] = jnp.zeros_like(acc_ref)

        # Unclamped logical start row of this step.  The index_map clamps the
        # DMA window to stay in-bounds; masking below uses this *logical*
        # position so partial / dead tiles contribute exactly zero.
        row0 = (c * tiles_per_shard + i) * block_rows

        def fold(v):  # (slab_rows, LANE) -> (SUBLANES, LANE): pure vreg adds
            return jnp.sum(v.reshape(-1, SUBLANES, LANE), axis=0)

        def accumulate(masked):
            def run():
                def body(s, carry):
                    pm_acc, p_acc, m_acc, bce_acc = carry
                    r = pl.multiple_of(s * slab_rows, slab_rows)
                    x = x_ref[pl.ds(r, slab_rows), :].astype(jnp.float32)
                    m = m_ref[pl.ds(r, slab_rows), :].astype(jnp.float32)
                    if masked:
                        gr = row0 + r + lax.broadcasted_iota(
                            jnp.int32, (slab_rows, LANE), 0)
                        valid = gr < rows
                    else:
                        valid = None
                    pm, p, mm, bce = slab_terms(x, m, valid)
                    return (pm_acc + fold(pm), p_acc + fold(p),
                            m_acc + fold(mm), bce_acc + fold(bce))

                # Accumulator lives in vregs across the slab loop; acc_ref is
                # touched only once per grid step.
                carry = (acc_ref[0], acc_ref[1], acc_ref[2], acc_ref[3])
                carry = lax.fori_loop(0, num_slabs, body, carry,
                                      unroll=min(INNER_UNROLL, num_slabs))
                acc_ref[0] = carry[0]
                acc_ref[1] = carry[1]
                acc_ref[2] = carry[2]
                acc_ref[3] = carry[3]
            return run

        if has_partial:
            is_partial = row0 + block_rows > rows
            pl.when(is_partial)(accumulate(True))          # boundary/dead tile
            pl.when(jnp.logical_not(is_partial))(accumulate(False))  # fast path
        else:
            accumulate(False)()

        @pl.when(i == pl.num_programs(1) - 1)
        def _finalize():
            # Lane-dense (1, 4, LANE) partials; tiny final reduce in wrapper.
            o_ref[...] = jnp.sum(acc_ref[...], axis=1)[None]

    return kernel


def _partial_sums_jnp(x, m, assume_binary_mask=False):
    """Plain-jnp partial sums for the (tiny) lane remainder / tiny inputs."""
    x = x.astype(jnp.float32)
    m = m.astype(jnp.float32)
    p = jax.nn.sigmoid(x)
    if assume_binary_mask:
        bce = -jnp.maximum(jnp.log(m * x + (1.0 - m) * (1.0 - x)), -100.0)
    else:
        log_x = jnp.maximum(jnp.log(x), -100.0)
        log_1mx = jnp.maximum(jnp.log1p(-x), -100.0)
        bce = -(log_1mx + m * (log_x - log_1mx))
    return jnp.sum(p * m), jnp.sum(p), jnp.sum(m), jnp.sum(bce)


def _default_num_shards():
    # 2 TensorCores per chip only on v7x; on single-TC v5e/v6e a size-2
    # "parallel" axis is just a sequential loop with extra rounding waste.
    try:
        kind = jax.devices()[0].device_kind.lower()
    except Exception:
        return 1
    return 2 if ("v7" in kind or "7x" in kind) else 1


def combined_loss3(outputs, masks, smooth=1.0, alpha=0.5, *,
                   assume_binary_mask=False, num_shards=None):
    """Pallas implementation of CombinedLoss3.forward. Returns a scalar f32.

    `masks` may be any float / narrow dtype (e.g. bf16); the kernel casts
    per-tile, so narrow masks halve mask HBM traffic on v5e/v6e.
    """
    assert outputs.shape == masks.shape
    n = int(outputs.size)
    assert n > 0

    flat_x = outputs.reshape(-1)
    flat_m = masks.reshape(-1)

    rows = n // LANE          # full 128-lane rows handled by the kernel
    rem = n - rows * LANE     # < 128 trailing elements handled in the wrapper

    zero = jnp.float32(0.0)
    sum_pm = sum_p = sum_m = sum_bce = zero

    if rows >= SUBLANES:
        if rem:
            # TODO(synk): for lane-misaligned n this prefix slice may cost one
            # HBM copy; lane-aligned inputs (the common case) are zero-copy.
            x2 = flat_x[: rows * LANE].reshape(rows, LANE)
            m2 = flat_m[: rows * LANE].reshape(rows, LANE)
        else:
            x2 = flat_x.reshape(rows, LANE)   # pure bitcast, no HBM traffic
            m2 = flat_m.reshape(rows, LANE)

        if num_shards is None:
            num_shards = _default_num_shards()
        num_shards = max(1, int(num_shards))

        block_rows = min(TARGET_BLOCK_ROWS, (rows // SUBLANES) * SUBLANES)
        if block_rows >= SLAB_ROWS:
            block_rows -= block_rows % SLAB_ROWS
            slab_rows = SLAB_ROWS
        else:
            slab_rows = block_rows

        num_row_blocks = pl.cdiv(rows, block_rows)
        if num_row_blocks < num_shards:
            num_shards = 1
        tiles_per_shard = pl.cdiv(num_row_blocks, num_shards)
        has_partial = num_shards * tiles_per_shard * block_rows > rows
        last_block = num_row_blocks - 1

        def in_map(c, i):
            # Clamp so the DMA window always stays inside the array; in-kernel
            # masking (based on the unclamped index) zeroes any overlap.
            return (jnp.minimum(c * tiles_per_shard + i, last_block), 0)

        kernel = _make_kernel(rows, block_rows, slab_rows, tiles_per_shard,
                              has_partial, assume_binary_mask)

        partials = pl.pallas_call(
            kernel,
            out_shape=jax.ShapeDtypeStruct((num_shards, 4, LANE), jnp.float32),
            grid_spec=pltpu.PrefetchScalarGridSpec(
                num_scalar_prefetch=0,
                grid=(num_shards, tiles_per_shard),
                in_specs=[
                    pl.BlockSpec((block_rows, LANE), in_map),
                    pl.BlockSpec((block_rows, LANE), in_map),
                ],
                out_specs=pl.BlockSpec((1, 4, LANE), lambda c, i: (c, 0, 0)),
                scratch_shapes=[pltpu.VMEM((4, SUBLANES, LANE), jnp.float32)],
            ),
            compiler_params=pltpu.CompilerParams(
                # TODO(synk): verify on v7x (xprof) that the size-2 "parallel"
                # axis engages both TensorCores; switch to CORE_PARALLEL if not.
                dimension_semantics=("parallel", "arbitrary"),
                vmem_limit_bytes=32 * 1024 * 1024,
            ),
        )(x2, m2)

        sums = jnp.sum(partials, axis=(0, 2))  # (4,): shard + lane reduce
        sum_pm, sum_p, sum_m, sum_bce = sums[0], sums[1], sums[2], sums[3]
    else:
        # Tiny input: not worth a kernel launch; do it all in plain jnp.
        rem = n
        rows = 0

    if rem:
        r_pm, r_p, r_m, r_bce = _partial_sums_jnp(
            flat_x[rows * LANE:], flat_m[rows * LANE:], assume_binary_mask)
        sum_pm = sum_pm + r_pm
        sum_p = sum_p + r_p
        sum_m = sum_m + r_m
        sum_bce = sum_bce + r_bce

    dice = (2.0 * sum_pm + smooth) / (sum_p + sum_m + smooth)
    dice_loss = 1.0 - dice
    bce_loss = sum_bce / n
    return alpha * dice_loss + (1.0 - alpha) * bce_loss


def _reference_loss(outputs, masks, smooth=1.0, alpha=0.5):
    """Pure-JAX reference mirroring the PyTorch module."""
    x = outputs.astype(jnp.float32).reshape(-1)
    m = masks.astype(jnp.float32).reshape(-1)
    p = jax.nn.sigmoid(x)
    inter = jnp.sum(p * m)
    dice = (2.0 * inter + smooth) / (jnp.sum(p) + jnp.sum(m) + smooth)
    dice_loss = 1.0 - dice
    bce = jnp.mean(
        -(m * jnp.maximum(jnp.log(x), -100.0)
          + (1.0 - m) * jnp.maximum(jnp.log1p(-x), -100.0))
    )
    return alpha * dice_loss + (1.0 - alpha) * bce


if __name__ == "__main__":
    key = jax.random.PRNGKey(0)
    ks = jax.random.split(key, 8)

    def make_case(kx, km, shape, mask_dtype=jnp.float32):
        # Outputs are probabilities in (0,1) as nn.BCELoss requires.
        x = jax.random.uniform(kx, shape, jnp.float32,
                               minval=1e-4, maxval=1.0 - 1e-4)
        m = (jax.random.uniform(km, shape, jnp.float32) > 0.5).astype(mask_dtype)
        return x, m

    # 1) lane-aligned NCHW input -> single clean kernel block, no masking code.
    x1, m1 = make_case(ks[0], ks[1], (2, 4, 16, 16))
    l1 = jax.block_until_ready(combined_loss3(x1, m1, 1.0, 0.5))
    r1 = _reference_loss(x1, m1, 1.0, 0.5)
    assert jnp.allclose(l1, r1, atol=1e-5, rtol=1e-5), (l1, r1)

    # 2) tiny ragged input -> pure-jnp fallback path.
    x2, m2 = make_case(ks[2], ks[3], (1, 3, 17, 19))
    l2 = jax.block_until_ready(combined_loss3(x2, m2, 1.0, 0.5))
    r2 = _reference_loss(x2, m2, 1.0, 0.5)
    assert jnp.allclose(l2, r2, atol=1e-5, rtol=1e-5), (l2, r2)

    # 3) ragged size -> kernel path with in-kernel row masking + lane tail in wrapper.
    x3, m3 = make_case(ks[4], ks[5], (2, 3, 33, 37))
    l3 = jax.block_until_ready(combined_loss3(x3, m3, 1.0, 0.5))
    r3 = _reference_loss(x3, m3, 1.0, 0.5)
    assert jnp.allclose(l3, r3, atol=1e-5, rtol=1e-5), (l3, r3)

    # 4) larger aligned case -> streaming slab loop (16 slabs) + bf16 masks.
    x4, m4 = make_case(ks[6], ks[7], (2, 8, 64, 64), mask_dtype=jnp.bfloat16)
    l4 = jax.block_until_ready(combined_loss3(x4, m4, 1.0, 0.5))
    r4 = _reference_loss(x4, m4, 1.0, 0.5)
    assert jnp.allclose(l4, r4, atol=1e-5, rtol=1e-5), (l4, r4)

    print("KERNEL_OK")
</pallas_src>

<mosaic_0001>
module attributes {stable_mosaic.version = 11 : i64} {
  func.func @kernel(%arg0: i32, %arg1: i32, %arg2: memref<16x128xf32, #tpu.memory_space<vmem>>, %arg3: memref<16x128xf32, #tpu.memory_space<vmem>>, %arg4: memref<1x4x128xf32, #tpu.memory_space<vmem>>, %arg5: memref<4x8x128xf32, #tpu.memory_space<vmem>>) attributes {dimension_semantics = [#tpu.dimension_semantics<parallel>, #tpu.dimension_semantics<arbitrary>], iteration_bounds = array<i64: 1, 1>, scalar_prefetch = 0 : i64, scratch_operands = 1 : i64, tpu.core_type = #tpu.core_type<tc>, window_params = [{transform_indices = @transform_0, window_bounds = array<i64: 16, 128>}, {transform_indices = @transform_1, window_bounds = array<i64: 16, 128>}, {transform_indices = @transform_2, window_bounds = array<i64: 1, 4, 128>}]} {
    %c0_i32 = arith.constant 0 : i32
    %0 = arith.cmpi eq, %arg1, %c0_i32 : i32
    %1 = arith.extui %0 : i1 to i32
    %c0_i32_0 = arith.constant 0 : i32
    %2 = arith.cmpi ne, %1, %c0_i32_0 : i32
    scf.if %2 {
      %cst_34 = arith.constant 0.000000e+00 : f32
      %63 = vector.broadcast %cst_34 : f32 to vector<4x8x128xf32>
      %c0_35 = arith.constant 0 : index
      %c0_36 = arith.constant 0 : index
      %c0_37 = arith.constant 0 : index
      %64 = vector.load %arg5[%c0_35, %c0_36, %c0_37] : memref<4x8x128xf32, #tpu.memory_space<vmem>>, vector<4x8x128xf32>
      tpu.vector_store %arg5[%c0_35, %c0_36, %c0_37], %63 {strides = array<i32>} : memref<4x8x128xf32, #tpu.memory_space<vmem>>, vector<4x8x128xf32>,
    } else {
    }
    %c0 = arith.constant 0 : index
    %c0_1 = arith.constant 0 : index
    %c0_2 = arith.constant 0 : index
    %3 = vector.load %arg5[%c0, %c0_1, %c0_2] : memref<4x8x128xf32, #tpu.memory_space<vmem>>, vector<1x8x128xf32>
    %4 = vector.shape_cast %3 : vector<1x8x128xf32> to vector<8x128xf32>
    %c1 = arith.constant 1 : index
    %c0_3 = arith.constant 0 : index
    %c0_4 = arith.constant 0 : index
    %5 = vector.load %arg5[%c1, %c0_3, %c0_4] : memref<4x8x128xf32, #tpu.memory_space<vmem>>, vector<1x8x128xf32>
    %6 = vector.shape_cast %5 : vector<1x8x128xf32> to vector<8x128xf32>
    %c2 = arith.constant 2 : index
    %c0_5 = arith.constant 0 : index
    %c0_6 = arith.constant 0 : index
    %7 = vector.load %arg5[%c2, %c0_5, %c0_6] : memref<4x8x128xf32, #tpu.memory_space<vmem>>, vector<1x8x128xf32>
    %8 = vector.shape_cast %7 : vector<1x8x128xf32> to vector<8x128xf32>
    %c3 = arith.constant 3 : index
    %c0_7 = arith.constant 0 : index
    %c0_8 = arith.constant 0 : index
    %9 = vector.load %arg5[%c3, %c0_7, %c0_8] : memref<4x8x128xf32, #tpu.memory_space<vmem>>, vector<1x8x128xf32>
    %10 = vector.shape_cast %9 : vector<1x8x128xf32> to vector<8x128xf32>
    %c0_i32_9 = arith.constant 0 : i32
    %c16_i32 = arith.constant 16 : i32
    %11 = arith.muli %c0_i32_9, %c16_i32 : i32
    %12 = tpu.assume_multiple %11, 16 : i32
    %13 = arith.index_cast %12 : i32 to index
    %c0_10 = arith.constant 0 : index
    %14 = vector.load %arg2[%13, %c0_10] : memref<16x128xf32, #tpu.memory_space<vmem>>, vector<16x128xf32>
    %15 = arith.index_cast %12 : i32 to index
    %c0_11 = arith.constant 0 : index
    %16 = vector.load %arg3[%15, %c0_11] : memref<16x128xf32, #tpu.memory_space<vmem>>, vector<16x128xf32>
    %17 = arith.negf %14 : vector<16x128xf32>
    %18 = math.exp %17 : vector<16x128xf32>
    %cst = arith.constant 1.000000e+00 : f32
    %19 = vector.broadcast %cst : f32 to vector<16x128xf32>
    %20 = arith.addf %19, %18 : vector<16x128xf32>
    %21 = arith.divf %19, %20 : vector<16x128xf32>
    %22 = arith.mulf %21, %16 : vector<16x128xf32>
    %23 = math.log %14 : vector<16x128xf32>
    %cst_12 = arith.constant -1.000000e+02 : f32
    %24 = vector.broadcast %cst_12 : f32 to vector<16x128xf32>
    %25 = arith.maximumf %23, %24 : vector<16x128xf32>
    %cst_13 = arith.constant 0.000000e+00 : f32
    %26 = vector.broadcast %cst_13 : f32 to vector<16x128xf32>
    %27 = arith.subf %26, %14 : vector<16x128xf32>
    %28 = math.log1p %27 : vector<16x128xf32>
    %cst_14 = arith.constant -1.000000e+02 : f32
    %29 = vector.broadcast %cst_14 : f32 to vector<16x128xf32>
    %30 = arith.maximumf %28, %29 : vector<16x128xf32>
    %31 = arith.subf %25, %30 : vector<16x128xf32>
    %32 = arith.mulf %16, %31 : vector<16x128xf32>
    %33 = arith.addf %30, %32 : vector<16x128xf32>
    %cst_15 = arith.constant 0.000000e+00 : f32
    %34 = vector.broadcast %cst_15 : f32 to vector<16x128xf32>
    %35 = arith.subf %34, %33 : vector<16x128xf32>
    %36 = vector.shape_cast %22 : vector<16x128xf32> to vector<2x8x128xf32>
    %cst_16 = arith.constant dense<0.000000e+00> : vector<8x128xf32>
    %37 = vector.multi_reduction <add>, %36, %cst_16 [0] : vector<2x8x128xf32> to vector<8x128xf32>
    %38 = arith.addf %4, %37 : vector<8x128xf32>
    %39 = vector.shape_cast %21 : vector<16x128xf32> to vector<2x8x128xf32>
    %cst_17 = arith.constant dense<0.000000e+00> : vector<8x128xf32>
    %40 = vector.multi_reduction <add>, %39, %cst_17 [0] : vector<2x8x128xf32> to vector<8x128xf32>
    %41 = arith.addf %6, %40 : vector<8x128xf32>
    %42 = vector.shape_cast %16 : vector<16x128xf32> to vector<2x8x128xf32>
    %cst_18 = arith.constant dense<0.000000e+00> : vector<8x128xf32>
    %43 = vector.multi_reduction <add>, %42, %cst_18 [0] : vector<2x8x128xf32> to vector<8x128xf32>
    %44 = arith.addf %8, %43 : vector<8x128xf32>
    %45 = vector.shape_cast %35 : vector<16x128xf32> to vector<2x8x128xf32>
    %cst_19 = arith.constant dense<0.000000e+00> : vector<8x128xf32>
    %46 = vector.multi_reduction <add>, %45, %cst_19 [0] : vector<2x8x128xf32> to vector<8x128xf32>
    %47 = arith.addf %10, %46 : vector<8x128xf32>
    %c1_i32 = arith.constant 1 : i32
    %c0_20 = arith.constant 0 : index
    %c0_21 = arith.constant 0 : index
    %c0_22 = arith.constant 0 : index
    %48 = vector.load %arg5[%c0_20, %c0_21, %c0_22] : memref<4x8x128xf32, #tpu.memory_space<vmem>>, vector<1x8x128xf32>
    %49 = vector.shape_cast %48 : vector<1x8x128xf32> to vector<8x128xf32>
    %50 = vector.shape_cast %38 : vector<8x128xf32> to vector<1x8x128xf32>
    tpu.vector_store %arg5[%c0_20, %c0_21, %c0_22], %50 {strides = array<i32>} : memref<4x8x128xf32, #tpu.memory_space<vmem>>, vector<1x8x128xf32>,
    %c1_23 = arith.constant 1 : index
    %c0_24 = arith.constant 0 : index
    %c0_25 = arith.constant 0 : index
    %51 = vector.load %arg5[%c1_23, %c0_24, %c0_25] : memref<4x8x128xf32, #tpu.memory_space<vmem>>, vector<1x8x128xf32>
    %52 = vector.shape_cast %51 : vector<1x8x128xf32> to vector<8x128xf32>
    %53 = vector.shape_cast %41 : vector<8x128xf32> to vector<1x8x128xf32>
    tpu.vector_store %arg5[%c1_23, %c0_24, %c0_25], %53 {strides = array<i32>} : memref<4x8x128xf32, #tpu.memory_space<vmem>>, vector<1x8x128xf32>,
    %c2_26 = arith.constant 2 : index
    %c0_27 = arith.constant 0 : index
    %c0_28 = arith.constant 0 : index
    %54 = vector.load %arg5[%c2_26, %c0_27, %c0_28] : memref<4x8x128xf32, #tpu.memory_space<vmem>>, vector<1x8x128xf32>
    %55 = vector.shape_cast %54 : vector<1x8x128xf32> to vector<8x128xf32>
    %56 = vector.shape_cast %44 : vector<8x128xf32> to vector<1x8x128xf32>
    tpu.vector_store %arg5[%c2_26, %c0_27, %c0_28], %56 {strides = array<i32>} : memref<4x8x128xf32, #tpu.memory_space<vmem>>, vector<1x8x128xf32>,
    %c3_29 = arith.constant 3 : index
    %c0_30 = arith.constant 0 : index
    %c0_31 = arith.constant 0 : index
    %57 = vector.load %arg5[%c3_29, %c0_30, %c0_31] : memref<4x8x128xf32, #tpu.memory_space<vmem>>, vector<1x8x128xf32>
    %58 = vector.shape_cast %57 : vector<1x8x128xf32> to vector<8x128xf32>
    %59 = vector.shape_cast %47 : vector<8x128xf32> to vector<1x8x128xf32>
    tpu.vector_store %arg5[%c3_29, %c0_30, %c0_31], %59 {strides = array<i32>} : memref<4x8x128xf32, #tpu.memory_space<vmem>>, vector<1x8x128xf32>,
    %c0_i32_32 = arith.constant 0 : i32
    %60 = arith.cmpi eq, %arg1, %c0_i32_32 : i32
    %61 = arith.extui %60 : i1 to i32
    %c0_i32_33 = arith.constant 0 : i32
    %62 = arith.cmpi ne, %61, %c0_i32_33 : i32
    scf.if %62 {
      %c0_34 = arith.constant 0 : index
      %c0_35 = arith.constant 0 : index
      %c0_36 = arith.constant 0 : index
      %63 = vector.load %arg5[%c0_34, %c0_35, %c0_36] : memref<4x8x128xf32, #tpu.memory_space<vmem>>, vector<4x8x128xf32>
      %cst_37 = arith.constant dense<0.000000e+00> : vector<4x128xf32>
      %64 = vector.multi_reduction <add>, %63, %cst_37 [1] : vector<4x8x128xf32> to vector<4x128xf32>
      %65 = vector.shape_cast %64 : vector<4x128xf32> to vector<1x4x128xf32>
      %c0_38 = arith.constant 0 : index
      %c0_39 = arith.constant 0 : index
      %c0_40 = arith.constant 0 : index
      %66 = vector.load %arg4[%c0_38, %c0_39, %c0_40] : memref<1x4x128xf32, #tpu.memory_space<vmem>>, vector<1x4x128xf32>
      tpu.vector_store %arg4[%c0_38, %c0_39, %c0_40], %65 {strides = array<i32>} : memref<1x4x128xf32, #tpu.memory_space<vmem>>, vector<1x4x128xf32>,
    } else {
    }
    return
  }
  func.func @transform_0(%arg0: i32, %arg1: i32) -> (i32, i32) {
    %c1_i32 = arith.constant 1 : i32
    %0 = arith.muli %arg0, %c1_i32 : i32
    %1 = arith.addi %0, %arg1 : i32
    %c0_i32 = arith.constant 0 : i32
    %2 = arith.minsi %1, %c0_i32 : i32
    %c0_i32_0 = arith.constant 0 : i32
    %c0_i32_1 = arith.constant 0 : i32
    return %2, %c0_i32_0 : i32, i32
  }
  func.func @transform_1(%arg0: i32, %arg1: i32) -> (i32, i32) {
    %c1_i32 = arith.constant 1 : i32
    %0 = arith.muli %arg0, %c1_i32 : i32
    %1 = arith.addi %0, %arg1 : i32
    %c0_i32 = arith.constant 0 : i32
    %2 = arith.minsi %1, %c0_i32 : i32
    %c0_i32_0 = arith.constant 0 : i32
    %c0_i32_1 = arith.constant 0 : i32
    return %2, %c0_i32_0 : i32, i32
  }
  func.func @transform_2(%arg0: i32, %arg1: i32) -> (i32, i32, i32) {
    %c0_i32 = arith.constant 0 : i32
    %c0_i32_0 = arith.constant 0 : i32
    %c0_i32_1 = arith.constant 0 : i32
    return %arg0, %c0_i32, %c0_i32_0 : i32, i32, i32
  }
}

</mosaic_0001>

<bundles_post_ra>
// kernel: tpu_custom_call.1
= control target key start
LH: loop header
LB: loop body
LE: loop exit
PB: predicated region body
PF: predicated region fallthrough
CT: control target
= control target key end

     0   :  { %7 = vsyncpa [#allocation4], 0  ;;  %s367_s0 = inlined_call_operand.hbm [shape: f32[16,128], index: 0, kind: input, shape index: {}]   ;;  %s368_s1 = inlined_call_operand.hbm [shape: f32[16,128], index: 1, kind: input, shape index: {}]   ;;  %s369_s2 = inlined_call_operand.hbm [shape: f32[1,4,128], index: 2, kind: output, shape index: {}]  }
   0x1   :  { %8 = vsyncpa [#allocation7], 0 }
   0x2   :  { %9 = vsyncpa [#allocation5], 0  ;;  %s20_s11 = sshll.u32 %s367_s0, 4  ;;  %s337_s12 = smov [#allocation3]   ;;  %s21_s11 = int_to_ptr.hbm [resolvable:$true] %s20_s11 }
   0x3   :  { %s22_s13 = sshll.u32 %s337_s12, 4  ;;  %s39_s16 = sshll.u32 %s368_s1, 4  ;;  %s23_s13 = int_to_ptr.vmem [resolvable:$true] %s22_s13  ;;  %s40_s16 = int_to_ptr.hbm [resolvable:$true] %s39_s16 }
   0x4   :  { %s338_s17 = smov 128   ;;  %s339_s18 = smov 8  }
   0x5   :  { %28 = dma.hbm_to_vmem [thread:$0]  %s21_s11, 256, %s23_s13, [#allocation4], %s338_s17, %s338_s17, %s339_s18  }
   0x6   :  { %s340_s19 = smov [#allocation6]  }
   0x7   :  { %s41_s20 = sshll.u32 %s340_s19, 4  ;;  %s42_s20 = int_to_ptr.vmem [resolvable:$true] %s41_s20 }
   0x8   :  { %47 = dma.hbm_to_vmem [thread:$0]  %s40_s16, 256, %s42_s20, [#allocation7], %s338_s17, %s338_s17, %s339_s18  }
   0x9   :  { %331 = dma.done.wait [#allocation4], 256  }
   0xa   :  { %332 = vsyncadd [#allocation4], 4294967040 }
   0xb   :  { %333 = dma.done.wait [#allocation7], 256  }
   0xc   :  { %334 = vsyncadd [#allocation7], 4294967040  ;;  %v79_v0 = vld [vmem:[#allocation3] sm:$0xff]  ;;  %v80_v1 = vld [vmem:[#allocation3 + $0x8] sm:$0xff]  ;;  %vm206_vm10 = vcmask 1041409   ;;  %vm208_vm11 = vcmask 1042434  }
   0xd   :  { %v236_v2 = vmul.f32 -1.442695, %v79_v0  ;;  %v237_v3 = vmul.f32 -1.442695, %v80_v1  ;;  %243 = vlog2.f32 %v79_v0  ;;  %v129_v4 = vsub.f32 0.0, %v79_v0  ;;  %v81_v32 = vld [vmem:[#allocation6] sm:$0xff] }
   0xe   :  { %245 = vlog2.f32 %v80_v1  ;;  %v130_v5 = vsub.f32 0.0, %v80_v1  ;;  %v82_v33 = vld [vmem:[#allocation6 + $0x8] sm:$0xff]  ;;  %s341_s0 = smov [#allocation8]   ;;  %s221_s23 = sshll.u32 %s369_s2, 4  ;;  %vm210_vm12 = vcmask 1043459   ;;  %s222_s23 = int_to_ptr.hbm [resolvable:$true] %s221_s23 }
   0xf   :  { %247 = vpow2.f32 %v236_v2  ;;  %v131_v6 = vadd.f32 1.0, %v129_v4  ;;  %v134_v7 = vmul.f32 -0.5, %v129_v4  ;;  %v137_v15 = vand.u32 2147483647, %v129_v4  ;;  %s219_s1 = sshll.u32 %s341_s0, 4  ;;  %s220_s1 = int_to_ptr.vmem [resolvable:$true] %s219_s1 }
  0x10   :  { %249 = vpow2.f32 %v237_v3  ;;  %v140_v8 = vadd.f32 1.0, %v130_v5  ;;  %v143_v9 = vmul.f32 -0.5, %v130_v5  ;;  %v146_v16 = vand.u32 2147483647, %v130_v5 }
  0x11   :  { %251 = vlog2.f32 %v131_v6  ;;  %v135_v12 = vadd.f32 1.0, %v134_v7  ;;  %vm138_vm0 = vcmp.lt.f32.partialorder %v137_v15, 0.0004427343  ;;  %v163_v37 = vadd.f32 %v82_v33, %v81_v32 }
  0x12   :  { %253 = vlog2.f32 %v140_v8  ;;  %v144_v13 = vadd.f32 1.0, %v143_v9  ;;  %vm147_vm1 = vcmp.lt.f32.partialorder %v146_v16, 0.0004427343 }
  0x13   :  { %v244_v10 = vpop.eup %243  ;;  %v136_v24 = vmul.f32 %v135_v12, %v129_v4  ;;  %v190_v54 = vrot.slane %v163_v37, 4 }
  0x14   :  { %v246_v11 = vpop.eup %245  ;;  %v124_v21 = vmul.f32 0.6931472, %v244_v10  ;;  %v145_v25 = vmul.f32 %v144_v13, %v130_v5 }
  0x15   :  { %v248_v14 = vpop.eup %247  ;;  %v126_v22 = vmul.f32 0.6931472, %v246_v11  ;;  %v191_v0 = vadd.f32 %v190_v54, %v163_v37 }
  0x16   :  { %v250_v17 = vpop.eup %249  ;;  %v89_v18 = vadd.f32 1.0, %v248_v14  ;;  %v127_v28 = vmax.f32 %v124_v21, -100.0 }
  0x17   :  { %v252_v19 = vpop.eup %251  ;;  %v90_v20 = vadd.f32 1.0, %v250_v17  ;;  %v128_v29 = vmax.f32 %v126_v22, -100.0  ;;  %v192_v8 = vrot.slane %v191_v0, 2 }
  0x18   :  { %v254_v23 = vpop.eup %253  ;;  %255 = vrcp.f32 %v89_v18  ;;  %v133_v26 = vmul.f32 0.6931472, %v252_v19  ;;  %vm96_vm2 = vweird.f32 %v89_v18  ;;  %v100_v42 = vand.u32 2147483647, %v89_v18 }
  0x19   :  { %257 = vrcp.f32 %v90_v20  ;;  %v142_v27 = vmul.f32 0.6931472, %v254_v23  ;;  %v102_v43 = vand.u32 2147483648, %v89_v18  ;;  %v117_v45 = vand.u32 2147483648, %v90_v20 }
  0x1a   :  { %v139_v30 = vsel %vm138_vm0, %v136_v24, %v133_v26  ;;  %vm111_vm4 = vweird.f32 %v90_v20  ;;  %v115_v50 = vand.u32 2147483647, %v90_v20  ;;  %vm101_vm7 = vcmp.eq.f32.partialorder %v100_v42, 8.507059e+37 }
  0x1b   :  { %v148_v31 = vsel %vm147_vm1, %v145_v25, %v142_v27  ;;  %v149_v34 = vmax.f32 %v139_v30, -100.0  ;;  %v103_v55 = vor.u32 1.1754944e-38, %v102_v43  ;;  %v118_v58 = vor.u32 1.1754944e-38, %v117_v45 }
  0x1c   :  { %v150_v35 = vmax.f32 %v148_v31, -100.0  ;;  %vm116_vm9 = vcmp.eq.f32.partialorder %v115_v50, 8.507059e+37  ;;  %v193_v15 = vadd.f32 %v192_v8, %v191_v0 }
  0x1d   :  { %v151_v40 = vsub.f32 %v127_v28, %v149_v34 }
  0x1e   :  { %v256_v36 = vpop.eup %255  ;;  %v152_v41 = vsub.f32 %v128_v29, %v150_v35  ;;  %v194_v21 = vrot.slane %v193_v15, 1 }
  0x1f   :  { %v258_v38 = vpop.eup %257  ;;  %v92_v39 = vmul.f32 %v256_v36, %v89_v18  ;;  %vm97_vm3 = vweird.f32 %v256_v36  ;;  %v153_v47 = vmul.f32 %v151_v40, %v81_v32 }
  0x20   :  { %v107_v44 = vmul.f32 %v258_v38, %v90_v20  ;;  %v154_v48 = vmul.f32 %v152_v41, %v82_v33  ;;  %vm112_vm5 = vweird.f32 %v258_v38  ;;  %vm98_vm6 = vmor %vm96_vm2, %vm97_vm3  ;;  %v195_v27 = vadd.f32 %v194_v21, %v193_v15 }
  0x21   :  { %v93_v46 = vsub.f32 1.0, %v92_v39  ;;  %v155_v52 = vadd.f32 %v153_v47, %v149_v34  ;;  %vm113_vm8 = vmor %vm111_vm4, %vm112_vm5 }
  0x22   :  { %v108_v49 = vsub.f32 1.0, %v107_v44  ;;  %v156_v53 = vadd.f32 %v154_v48, %v150_v35 }
  0x23   :  { %v94_v51 = vmul.f32 %v256_v36, %v93_v46  ;;  %v157_v59 = vsub.f32 0.0, %v155_v52 }
  0x24   :  { %v109_v56 = vmul.f32 %v258_v38, %v108_v49  ;;  %v158_v60 = vsub.f32 0.0, %v156_v53 }
  0x25   :  { %v95_v57 = vadd.f32 %v256_v36, %v94_v51 }
  0x26   :  { %v110_v61 = vadd.f32 %v258_v38, %v109_v56  ;;  %v165_v63 = vadd.f32 %v158_v60, %v157_v59 }
  0x27   :  { %v99_v62 = vsel %vm98_vm6, %v256_v36, %v95_v57 }
  0x28   :  { %v104_v1 = vsel %vm101_vm7, %v103_v55, %v99_v62  ;;  %v114_v2 = vsel %vm113_vm8, %v258_v38, %v110_v61  ;;  %v196_v5 = vrot.slane %v165_v63, 4 }
  0x29   :  { %v119_v3 = vsel %vm116_vm9, %v118_v58, %v114_v2  ;;  %v121_v4 = vmul.f32 %v104_v1, %v81_v32 }
  0x2a   :  { %v122_v6 = vmul.f32 %v119_v3, %v82_v33  ;;  %v161_v7 = vadd.f32 %v119_v3, %v104_v1  ;;  %v197_v9 = vadd.f32 %v196_v5, %v165_v63 }
  0x2c   :  { %v159_v10 = vadd.f32 %v122_v6, %v121_v4  ;;  %v184_v11 = vrot.slane %v161_v7, 4  ;;  %v198_v12 = vrot.slane %v197_v9, 2 }
  0x2e   :  { %v178_v13 = vrot.slane %v159_v10, 4  ;;  %v185_v14 = vadd.f32 %v184_v11, %v161_v7  ;;  %v199_v18 = vadd.f32 %v198_v12, %v197_v9 }
  0x30   :  { %v179_v16 = vadd.f32 %v178_v13, %v159_v10  ;;  %v186_v17 = vrot.slane %v185_v14, 2  ;;  %v200_v24 = vrot.slane %v199_v18, 1 }
  0x32   :  { %v180_v19 = vrot.slane %v179_v16, 2  ;;  %v187_v20 = vadd.f32 %v186_v17, %v185_v14  ;;  %v201_v29 = vadd.f32 %v200_v24, %v199_v18 }
  0x34   :  { %v181_v22 = vadd.f32 %v180_v19, %v179_v16  ;;  %v188_v23 = vrot.slane %v187_v20, 1 }
  0x36   :  { %v182_v25 = vrot.slane %v181_v22, 1  ;;  %v189_v26 = vadd.f32 %v188_v23, %v187_v20 }
  0x38   :  { %v183_v28 = vadd.f32 %v182_v25, %v181_v22 }
  0x3a   :  { %v207_v30 = vsel %vm206_vm10, %v189_v26, %v183_v28 }
  0x3b   :  { %v209_v31 = vsel %vm208_vm11, %v195_v27, %v207_v30 }
  0x3c   :  { %v211_v32 = vsel %vm210_vm12, %v201_v29, %v209_v31 }
  0x3d   :  { %213 = vst [vmem:[#allocation8] sm:$0xf] %v211_v32 }
  0x3e   :  { %224 = dma.vmem_to_hbm [thread:$0]  %s220_s1, 64, %s222_s23, [#allocation5]  }
  0x3f   :  { %335 = dma.done.wait [#allocation5], 64  }
  0x40   :  { %336 = vsyncadd [#allocation5], 4294967232 }
  0x41   :  { %229 = vsyncpa [#allocation4], 1 }
  0x42   :  { %230 = vsyncpa [#allocation7], 1 }
  0x43   :  { %231 = vsyncpa [#allocation5], 1 }

</bundles_post_ra>
